<compile_context>
chip_gen: v6e
topology: v6e:2x2x1
jax: 0.10.0
libtpu: 0.0.40
codegen_flags: <defaults>
</compile_context>

<pallas_src>
import functools

import jax
import jax.numpy as jnp
from jax import lax
from jax.experimental import pallas as pl
from jax.experimental.pallas import tpu as pltpu


def _poscnn_kernel(x_ref, w_ref, b_ref, mtop_ref, mbot_ref, o_ref, *, C):
    """Depthwise 3x3 conv (stride 1, pad 1) + bias + residual on a (R, W*C) slab.

    x_ref:    (R, W*C)   R = images_per_block * H; lane index = w*C + c
    w_ref:    (9, W*C)   tap (dh, dw) in row 3*(dh+1)+(dw+1); W-border zeros and
                         the +1 residual are already folded in host-side
    b_ref:    (1, W*C)   bias, tiled along W
    mtop_ref: (R, 1)     1.0 where the h-1 source row exists inside its image
    mbot_ref: (R, 1)     1.0 where the h+1 source row exists inside its image
    """
    x = x_ref[...]
    R, WC = x.shape

    # W-axis neighbours via lane rolls (XLU slot, off the VALU critical path).
    # The wrap-around lanes are killed by the zeroed tap weights.
    x_wm = pltpu.roll(x, C, axis=1)        # value at (h, w-1, c)
    x_wp = pltpu.roll(x, WC - C, axis=1)   # value at (h, w+1, c)

    def band(dh):
        base = 3 * (dh + 1)
        return (x_wm * w_ref[pl.ds(base + 0, 1), :]
                + x * w_ref[pl.ds(base + 1, 1), :]
                + x_wp * w_ref[pl.ds(base + 2, 1), :])

    mid = band(0)                                              # centre row (+ residual)
    top = pltpu.roll(band(-1), 1, axis=0) * mtop_ref[...]      # source row h-1
    bot = pltpu.roll(band(1), R - 1, axis=0) * mbot_ref[...]   # source row h+1
    o_ref[...] = (mid + top + bot + b_ref[...]).astype(o_ref.dtype)


def _images_per_block(B, H, WC, itemsize):
    """Whole images per grid block.

    Constraints / preferences:
      * block_rows = bt*H must be a multiple of 8 (sublane tiling) unless the
        block covers the whole array,
      * keep at least two grid steps so both v7x TensorCores get work,
      * prefer block_rows that also matches the packed sublane tile of the
        dtype (16 rows for bf16, 32 for int8) to avoid relayouts,
      * stay under a ~2 MiB block so double-buffered in+out plus the in-kernel
        intermediates fit the scoped VMEM budget on every generation.
    """
    per_image = max(H * WC * itemsize, 1)
    target = 2 << 20
    pref_rows = max(8, 32 // max(itemsize, 1))    # packed sublane tile height

    def legal(d):
        return (d * H) % 8 == 0 or d == B         # full-array block is always legal

    candidates = [d for d in range(1, B + 1) if B % d == 0 and legal(d)]
    within = [d for d in candidates if d * per_image <= target]
    if not within:
        # TODO(synk): row-band tiling with a 1-row halo for images larger than
        # the block target (early high-resolution stages); for now take the
        # smallest legal whole-image block.
        within = [min(candidates)]

    def score(d):
        steps = B // d
        return (
            steps >= 2,                   # megacore: keep both v7x cores busy
            (d * H) % pref_rows == 0,     # packed-dtype-friendly sublane count
            steps % 2 == 0,               # balanced split across 2 cores
            d,                            # amortize per-step overhead
        )

    return max(within, key=score)


def pos_cnn_forward(x_tokens, H, W, weight_hwc, bias, stride=1):
    """PosCNN forward.

    x_tokens:   (B, T=H*W, C)
    weight_hwc: (3, 3, C), weight_hwc[i, j, c] == torch Conv2d(C, C, 3,
                groups=C).weight[c, 0, i, j]
    bias:       (C,)
    Returns (B, T, C).
    """
    # TODO(synk): stride != 1 path (strided depthwise conv, no residual) not implemented.
    assert stride == 1
    B, T, C = x_tokens.shape
    assert T == H * W
    WC = W * C
    dtype = x_tokens.dtype

    # (B, T, C) -> (B*H, W*C): pure reshape, element-for-element identical to
    # torch's transpose(1, 2).view(B, C, H, W) pixel ordering.
    x2d = x_tokens.reshape(B * H, WC)

    # Per-lane tap weights (lane w*C + c carries channel c), precomputed in the
    # compute dtype with all border / residual handling baked in.
    w9 = weight_hwc.reshape(9, C).astype(dtype)
    w9 = w9.at[4].add(jnp.asarray(1, dtype))                 # fold the +x residual
    w_flat = jnp.tile(w9, (1, W))                            # (9, W*C)
    lane = jnp.arange(WC)
    m_left = (lane >= C).astype(dtype)                       # w-1 source exists
    m_right = (lane < WC - C).astype(dtype)                  # w+1 source exists
    tap_mask = jnp.stack([m_left, jnp.ones_like(m_left), m_right] * 3)
    w_flat = w_flat * tap_mask                               # zero W-border wrap taps
    b_flat = jnp.tile(bias.astype(dtype), W).reshape(1, WC)

    bt = _images_per_block(B, H, WC, dtype.itemsize)
    block_rows = bt * H
    rows_in_img = jnp.arange(block_rows) % H
    mask_top = (rows_in_img >= 1).astype(dtype).reshape(block_rows, 1)
    mask_bot = (rows_in_img <= H - 2).astype(dtype).reshape(block_rows, 1)

    out2d = pl.pallas_call(
        functools.partial(_poscnn_kernel, C=C),
        out_shape=jax.ShapeDtypeStruct((B * H, WC), dtype),
        grid_spec=pltpu.PrefetchScalarGridSpec(
            num_scalar_prefetch=0,
            grid=(B // bt,),
            in_specs=[
                pl.BlockSpec((block_rows, WC), lambda i: (i, 0)),
                pl.BlockSpec((9, WC), lambda i: (0, 0)),
                pl.BlockSpec((1, WC), lambda i: (0, 0)),
                pl.BlockSpec((block_rows, 1), lambda i: (0, 0)),
                pl.BlockSpec((block_rows, 1), lambda i: (0, 0)),
            ],
            out_specs=pl.BlockSpec((block_rows, WC), lambda i: (i, 0)),
        ),
        compiler_params=pltpu.CompilerParams(
            dimension_semantics=("parallel",),
            vmem_limit_bytes=32 << 20),
    )(x2d, w_flat, b_flat, mask_top, mask_bot)

    return out2d.reshape(B, T, C)


def reference_forward(x_tokens, H, W, weight_hwc, bias):
    """Pure-JAX reference (depthwise conv via feature_group_count)."""
    B, T, C = x_tokens.shape
    feat = x_tokens.reshape(B, H, W, C)
    w_hwio = weight_hwc.reshape(3, 3, 1, C)   # HWIO with I/groups = 1
    conv = lax.conv_general_dilated(
        feat, w_hwio, window_strides=(1, 1), padding=((1, 1), (1, 1)),
        dimension_numbers=("NHWC", "HWIO", "NHWC"),
        feature_group_count=C)
    out = conv + bias[None, None, None, :] + feat
    return out.reshape(B, T, C)


if __name__ == "__main__":
    B, C, H, W = 2, 32, 8, 8   # n_embd = in_channels = C (depthwise); W*C = 256 lanes
    T = H * W

    key = jax.random.PRNGKey(0)
    kx, kw, kb = jax.random.split(key, 3)
    x = jax.random.normal(kx, (B, T, C), dtype=jnp.float32)
    # Conv2d(C, C, 3, groups=C) weight is (C, 1, 3, 3) in torch; stored HWC here.
    weight = jax.random.normal(kw, (3, 3, C), dtype=jnp.float32) * 0.1
    bias = jax.random.normal(kb, (C,), dtype=jnp.float32) * 0.1

    out = jax.block_until_ready(pos_cnn_forward(x, H, W, weight, bias, stride=1))
    ref = jax.block_until_ready(reference_forward(x, H, W, weight, bias))
    max_err = float(jnp.max(jnp.abs(out - ref)))
    assert out.shape == (B, T, C)
    assert max_err < 1e-4, f"mismatch vs reference: {max_err}"

    print("KERNEL_OK")
</pallas_src>

<mosaic_0001>
module attributes {stable_mosaic.version = 11 : i64} {
  func.func @_poscnn_kernel(%arg0: i32, %arg1: memref<8x256xf32, #tpu.memory_space<vmem>>, %arg2: memref<9x256xf32, #tpu.memory_space<vmem>>, %arg3: memref<1x256xf32, #tpu.memory_space<vmem>>, %arg4: memref<8x1xf32, #tpu.memory_space<vmem>>, %arg5: memref<8x1xf32, #tpu.memory_space<vmem>>, %arg6: memref<8x256xf32, #tpu.memory_space<vmem>>) attributes {dimension_semantics = [#tpu.dimension_semantics<parallel>], iteration_bounds = array<i64: 2>, scalar_prefetch = 0 : i64, scratch_operands = 0 : i64, tpu.core_type = #tpu.core_type<tc>, window_params = [{transform_indices = @transform_0, window_bounds = array<i64: 8, 256>}, {pipeline_mode = #tpu.pipeline_mode<synchronous>, transform_indices = @transform_1, window_bounds = array<i64: 9, 256>}, {pipeline_mode = #tpu.pipeline_mode<synchronous>, transform_indices = @transform_2, window_bounds = array<i64: 1, 256>}, {pipeline_mode = #tpu.pipeline_mode<synchronous>, transform_indices = @transform_3, window_bounds = array<i64: 8, 1>}, {pipeline_mode = #tpu.pipeline_mode<synchronous>, transform_indices = @transform_4, window_bounds = array<i64: 8, 1>}, {transform_indices = @transform_5, window_bounds = array<i64: 8, 256>}]} {
    %c0 = arith.constant 0 : index
    %c0_0 = arith.constant 0 : index
    %0 = vector.load %arg1[%c0, %c0_0] : memref<8x256xf32, #tpu.memory_space<vmem>>, vector<8x256xf32>
    %c32_i32 = arith.constant 32 : i32
    %1 = tpu.dynamic_rotate %0 by %c32_i32 dim 1 : vector<8x256xf32>, i32 -> vector<8x256xf32>
    %c224_i32 = arith.constant 224 : i32
    %2 = tpu.dynamic_rotate %0 by %c224_i32 dim 1 : vector<8x256xf32>, i32 -> vector<8x256xf32>
    %c3 = arith.constant 3 : index
    %c0_1 = arith.constant 0 : index
    %3 = vector.load %arg2[%c3, %c0_1] : memref<9x256xf32, #tpu.memory_space<vmem>>, vector<1x256xf32>
    %4 = vector.broadcast %3 : vector<1x256xf32> to vector<8x256xf32>
    %5 = arith.mulf %1, %4 : vector<8x256xf32>
    %c4 = arith.constant 4 : index
    %c0_2 = arith.constant 0 : index
    %6 = vector.load %arg2[%c4, %c0_2] : memref<9x256xf32, #tpu.memory_space<vmem>>, vector<1x256xf32>
    %7 = vector.broadcast %6 : vector<1x256xf32> to vector<8x256xf32>
    %8 = arith.mulf %0, %7 : vector<8x256xf32>
    %9 = arith.addf %5, %8 : vector<8x256xf32>
    %c5 = arith.constant 5 : index
    %c0_3 = arith.constant 0 : index
    %10 = vector.load %arg2[%c5, %c0_3] : memref<9x256xf32, #tpu.memory_space<vmem>>, vector<1x256xf32>
    %11 = vector.broadcast %10 : vector<1x256xf32> to vector<8x256xf32>
    %12 = arith.mulf %2, %11 : vector<8x256xf32>
    %13 = arith.addf %9, %12 : vector<8x256xf32>
    %c0_4 = arith.constant 0 : index
    %c0_5 = arith.constant 0 : index
    %14 = vector.load %arg2[%c0_4, %c0_5] : memref<9x256xf32, #tpu.memory_space<vmem>>, vector<1x256xf32>
    %15 = vector.broadcast %14 : vector<1x256xf32> to vector<8x256xf32>
    %16 = arith.mulf %1, %15 : vector<8x256xf32>
    %c1 = arith.constant 1 : index
    %c0_6 = arith.constant 0 : index
    %17 = vector.load %arg2[%c1, %c0_6] : memref<9x256xf32, #tpu.memory_space<vmem>>, vector<1x256xf32>
    %18 = vector.broadcast %17 : vector<1x256xf32> to vector<8x256xf32>
    %19 = arith.mulf %0, %18 : vector<8x256xf32>
    %20 = arith.addf %16, %19 : vector<8x256xf32>
    %c2 = arith.constant 2 : index
    %c0_7 = arith.constant 0 : index
    %21 = vector.load %arg2[%c2, %c0_7] : memref<9x256xf32, #tpu.memory_space<vmem>>, vector<1x256xf32>
    %22 = vector.broadcast %21 : vector<1x256xf32> to vector<8x256xf32>
    %23 = arith.mulf %2, %22 : vector<8x256xf32>
    %24 = arith.addf %20, %23 : vector<8x256xf32>
    %c1_i32 = arith.constant 1 : i32
    %25 = tpu.dynamic_rotate %24 by %c1_i32 dim 0 : vector<8x256xf32>, i32 -> vector<8x256xf32>
    %c0_8 = arith.constant 0 : index
    %c0_9 = arith.constant 0 : index
    %26 = vector.load %arg4[%c0_8, %c0_9] : memref<8x1xf32, #tpu.memory_space<vmem>>, vector<8x1xf32>
    %27 = vector.broadcast %26 : vector<8x1xf32> to vector<8x256xf32>
    %28 = arith.mulf %25, %27 : vector<8x256xf32>
    %c6 = arith.constant 6 : index
    %c0_10 = arith.constant 0 : index
    %29 = vector.load %arg2[%c6, %c0_10] : memref<9x256xf32, #tpu.memory_space<vmem>>, vector<1x256xf32>
    %30 = vector.broadcast %29 : vector<1x256xf32> to vector<8x256xf32>
    %31 = arith.mulf %1, %30 : vector<8x256xf32>
    %c7 = arith.constant 7 : index
    %c0_11 = arith.constant 0 : index
    %32 = vector.load %arg2[%c7, %c0_11] : memref<9x256xf32, #tpu.memory_space<vmem>>, vector<1x256xf32>
    %33 = vector.broadcast %32 : vector<1x256xf32> to vector<8x256xf32>
    %34 = arith.mulf %0, %33 : vector<8x256xf32>
    %35 = arith.addf %31, %34 : vector<8x256xf32>
    %c8 = arith.constant 8 : index
    %c0_12 = arith.constant 0 : index
    %36 = vector.load %arg2[%c8, %c0_12] : memref<9x256xf32, #tpu.memory_space<vmem>>, vector<1x256xf32>
    %37 = vector.broadcast %36 : vector<1x256xf32> to vector<8x256xf32>
    %38 = arith.mulf %2, %37 : vector<8x256xf32>
    %39 = arith.addf %35, %38 : vector<8x256xf32>
    %c7_i32 = arith.constant 7 : i32
    %40 = tpu.dynamic_rotate %39 by %c7_i32 dim 0 : vector<8x256xf32>, i32 -> vector<8x256xf32>
    %c0_13 = arith.constant 0 : index
    %c0_14 = arith.constant 0 : index
    %41 = vector.load %arg5[%c0_13, %c0_14] : memref<8x1xf32, #tpu.memory_space<vmem>>, vector<8x1xf32>
    %42 = vector.broadcast %41 : vector<8x1xf32> to vector<8x256xf32>
    %43 = arith.mulf %40, %42 : vector<8x256xf32>
    %44 = arith.addf %13, %28 : vector<8x256xf32>
    %45 = arith.addf %44, %43 : vector<8x256xf32>
    %c0_15 = arith.constant 0 : index
    %c0_16 = arith.constant 0 : index
    %46 = vector.load %arg3[%c0_15, %c0_16] : memref<1x256xf32, #tpu.memory_space<vmem>>, vector<1x256xf32>
    %47 = vector.broadcast %46 : vector<1x256xf32> to vector<8x256xf32>
    %48 = arith.addf %45, %47 : vector<8x256xf32>
    %c0_17 = arith.constant 0 : index
    %c0_18 = arith.constant 0 : index
    %49 = vector.load %arg6[%c0_17, %c0_18] : memref<8x256xf32, #tpu.memory_space<vmem>>, vector<8x256xf32>
    tpu.vector_store %arg6[%c0_17, %c0_18], %48 {strides = array<i32>} : memref<8x256xf32, #tpu.memory_space<vmem>>, vector<8x256xf32>,
    return
  }
  func.func @transform_0(%arg0: i32) -> (i32, i32) {
    %c0_i32 = arith.constant 0 : i32
    %c0_i32_0 = arith.constant 0 : i32
    return %arg0, %c0_i32 : i32, i32
  }
  func.func @transform_1(%arg0: i32) -> (i32, i32) {
    %c0_i32 = arith.constant 0 : i32
    %c0_i32_0 = arith.constant 0 : i32
    %c0_i32_1 = arith.constant 0 : i32
    return %c0_i32, %c0_i32_0 : i32, i32
  }
  func.func @transform_2(%arg0: i32) -> (i32, i32) {
    %c0_i32 = arith.constant 0 : i32
    %c0_i32_0 = arith.constant 0 : i32
    %c0_i32_1 = arith.constant 0 : i32
    return %c0_i32, %c0_i32_0 : i32, i32
  }
  func.func @transform_3(%arg0: i32) -> (i32, i32) {
    %c0_i32 = arith.constant 0 : i32
    %c0_i32_0 = arith.constant 0 : i32
    %c0_i32_1 = arith.constant 0 : i32
    return %c0_i32, %c0_i32_0 : i32, i32
  }
  func.func @transform_4(%arg0: i32) -> (i32, i32) {
    %c0_i32 = arith.constant 0 : i32
    %c0_i32_0 = arith.constant 0 : i32
    %c0_i32_1 = arith.constant 0 : i32
    return %c0_i32, %c0_i32_0 : i32, i32
  }
  func.func @transform_5(%arg0: i32) -> (i32, i32) {
    %c0_i32 = arith.constant 0 : i32
    %c0_i32_0 = arith.constant 0 : i32
    return %arg0, %c0_i32 : i32, i32
  }
}

</mosaic_0001>

<bundles_post_ra>
// kernel: tpu_custom_call.1
= control target key start
LH: loop header
LB: loop body
LE: loop exit
PB: predicated region body
PF: predicated region fallthrough
CT: control target
= control target key end

     0   :  { %10 = vsyncpa [#allocation3], 0  ;;  %s1000_s0 = inlined_call_operand.hbm [shape: f32[16,256], index: 0, kind: input, shape index: {}]   ;;  %s1001_s1 = inlined_call_operand.hbm [shape: f32[9,256], index: 1, kind: input, shape index: {}]   ;;  %s1002_s2 = inlined_call_operand.vmem [shape: f32[1,256], index: 2, kind: input, shape index: {}]   ;;  %s1003_s3 = inlined_call_operand.vmem [shape: f32[8,1], index: 3, kind: input, shape index: {}]   ;;  %s1004_s4 = inlined_call_operand.vmem [shape: f32[8,1], index: 4, kind: input, shape index: {}]   ;;  %s1005_s5 = inlined_call_operand.hbm [shape: f32[16,256], index: 5, kind: output, shape index: {}]  }
   0x1   :  { %12 = vsyncpa [#allocation3 + $0x1], 0 }
   0x2   :  { %13 = vsyncpa [#allocation6], 0 }
   0x3   :  { %14 = vsyncpa [#allocation4], 0 }
   0x4   :  { %16 = vsyncpa [#allocation4 + $0x1], 0  ;;  %s799_s18 = smov 0   ;;  %s801_s19 = smov 0  }
   0x5   :  { %s803_s20 = smov 0   ;;  %s805_s21 = smov 0  }
   0x6 LB: > { %s820_s22 = sadd.s32 4294967295, %s759_s21   ;;  %s555_s23 = sadd.s32 4294967294, %s759_s21   ;;  %s759_s21 = sphi %s805_s21, %s1027_s21   ;;  %s755_s20 = sphi %s803_s20, %s1026_s20   ;;  %s751_s19 = sphi %s801_s19, %s1025_s19   ;;  %s747_s18 = sphi %s799_s18, %s1024_s18  }
   0x7   : > { %p42_p0 = scmp.ne.s32.totalorder %s751_s19, %s747_s18  ;;  %p1006_p1 = scmp.eq.s32.totalorder %s820_s22, 0 }
   0x8   : > { %p156_p3 = scmp.eq.s32.totalorder %s555_s23, 1  ;;  %p556_p5 = scmp.ge.s32.totalorder %s759_s21, 1 }
   0x9   : > { %p829_p4 = por %p1006_p1, %p42_p0  ;;  %p163_p7 = scmp.lt.s32.totalorder %s759_s21, 3 }
   0xa   : > { %p834_p6 = por %p156_p3, %p42_p0  ;;  %s761_s27 = smov [#allocation5]  }
   0xb   : > { %s1010_s24 = scalar_select %p829_p4, 1, 0 }
   0xc   : > { %s1011_s25 = scalar_select %p834_p6, 1, 0 }
   0xd   : > { %p839_p8 = pnand %p556_p5, %p163_p7  ;;  %s175_s28 = sshll.u32 %s761_s27, 4  ;;  %s176_s28 = int_to_ptr.vmem [resolvable:$true] %s175_s28 }
   0xe   : > { %s853_s30 = sadd.s32 1, %s759_s21   ;;  %s29_s6 = sadd.s32 1, %s755_s20 }
   0xf   : > { %s1012_s26 = scalar_select %p839_p8, 1, 0 }
  0x10   : > { %p581_p9 = pneg %p839_p8  ;;  %s26_s7 = ssub.s32 %s759_s21, %s853_s30 }
  0x11   : > { %s648_s8 = scalar_lea.vmem %s176_s28, 512  ;;  %p656_p5 = scmp.lt.s32.totalorder %s176_s28, %s176_s28 }
  0x12   : > { %p848_p11 = pnand %p581_p9, %p1006_p1  ;;  %p649_p13 = scmp.ne.s32.totalorder %s176_s28, %s648_s8 }
  0x13   : > { %p657_p7 = scmp.lt.s32.totalorder %s648_s8, %s648_s8 }
  0x14   : > { %p639_p12 = pneg %p848_p11 }
  0x15   : > { %p658_p10 = por %p657_p7, %p656_p5 }
  0x16   : > { %p651_p0 = pnand %p649_p13, %p639_p12 }
  0x18   : > { %p652_p3 = pneg %p651_p0 }
  0x1a   : > { %p659_p2 = pnand %p658_p10, %p652_p3 }
  0x1c   : > { %662 = shalt.err (!%p659_p2)
}
  0x1d   : > { %s762_s9 = smov 256   ;;  %s763_s10 = smov 16  }
  0x1e   : > { %584 = dma.hbm_to_vmem [thread:$0]  (!%p848_p11), %s1001_s1, 512, %s176_s28, [#allocation6], %s762_s9, %s762_s9, %s763_s10  }
  0x1f   : > { %p27_p9 = scmp.eq.s32.totalorder %s26_s7, 0  ;;  %p36_p12 = scmp.ne.s32.totalorder %s755_s20, %s751_s19 }
  0x20   : > { %p37_p10 = scmp.eq.s32.totalorder %s759_s21, 0  ;;  %p594_p2 = scmp.lt.s32.totalorder %s759_s21, 2 }
  0x21   : > { %s870_s13 = scalar_select %p27_p9, %s755_s20, %s29_s6  }
  0x22   : > { %p38_p13 = por %p37_p10, %p36_p12  ;;  %p1014_p0 = scmp.eq.s32.totalorder %s820_s22, 1 }
  0x23   : > { %s198_s15 = sand.u32 1, %s755_s20   ;;  %s571_s16 = sshll.u32 %s759_s21, 8 }
  0x24   : > { %p874_p3 = por %p1014_p0, %p36_p12  ;;  %s559_s17 = sshll.u32 %s198_s15, 4 }
  0x25   : > { %s883_s29 = scalar_lea.hbm %s1000_s0, %s571_s16  ;;  %s202_s28 = scalar_lea.vmem [#allocation2], %s559_s17 }
  0x26   : > { %s1015_s14 = scalar_select %p874_p3, 1, 0 }
  0x27   : > { %s210_s6 = sshll.u32 %s202_s28, 4  ;;  %p885_p11 = pnand %p594_p2, %p38_p13  ;;  %s211_s6 = int_to_ptr.vmem [resolvable:$true] %s210_s6 }
  0x28   : > { %s199_s8 = scalar_lea.sflag [#allocation3], %s198_s15  ;;  %s663_s9 = scalar_lea.hbm %s883_s29, 256 }
  0x29   : > { %p664_p5 = scmp.ne.s32.totalorder %s883_s29, %s663_s9  ;;  %p665_p7 = pneg %p885_p11 }
  0x2a   : > { %s668_s12 = scalar_lea.hbm %s1000_s0, 512  ;;  %p669_p10 = scmp.lt.s32.totalorder %s883_s29, %s1000_s0 }
  0x2b   : > { %p666_p9 = pnand %p665_p7, %p664_p5  ;;  %p670_p2 = scmp.lt.s32.totalorder %s668_s12, %s663_s9 }
  0x2d   : > { %p667_p12 = pneg %p666_p9  ;;  %p671_p13 = por %p670_p2, %p669_p10 }
  0x2f   : > { %p672_p0 = pnand %p671_p13, %p667_p12 }
  0x31   : > { %675 = shalt.err (!%p672_p0)
}
  0x32   : > { %s676_s23 = scalar_lea.vmem %s211_s6, 256  ;;  %s764_s15 = smov [#allocation2]  }
  0x33   : > { %p677_p1 = scmp.ne.s32.totalorder %s211_s6, %s676_s23  ;;  %s681_s27 = sshll.u32 %s764_s15, 4  ;;  %s682_s27 = int_to_ptr.vmem [resolvable:$false] %s681_s27 }
  0x34   : > { %s683_s28 = scalar_lea.vmem %s682_s27, 512  ;;  %p684_p5 = scmp.lt.s32.totalorder %s211_s6, %s682_s27 }
  0x35   : > { %p679_p6 = pnand %p677_p1, %p665_p7  ;;  %p685_p9 = scmp.lt.s32.totalorder %s683_s28, %s676_s23 }
  0x37   : > { %p680_p3 = pneg %p679_p6  ;;  %p686_p4 = por %p685_p9, %p684_p5 }
  0x39   : > { %p687_p8 = pnand %p686_p4, %p680_p3 }
  0x3b   : > { %690 = shalt.err (!%p687_p8)
}
  0x3c   : > { %588 = dma.hbm_to_vmem [thread:$0]  (!%p885_p11), %s883_s29, 256, %s211_s6, %s199_s8  }
  0x3d   : > { %p1017_p12 = scmp.ne.s32.totalorder %s1012_s26, 0 }
  0x3e   : > { %s906_s9 = sand.u32 (!%p1017_p12), 1, %s751_s19   ;;  %p1018_p1 = scmp.ne.s32.totalorder (!%p1017_p12), %s1010_s24, 0 }
  0x3f   : > { %219 = sbr.rel (%p1017_p12) target bundleno = 227 (0xe3), region = 40  ;;  %s563_s10 = sshll.u32 (!%p1017_p12), %s906_s9, 4 }
  0x40   : > { %s222_s11 = scalar_lea.sflag (!%p1017_p12), [#allocation3], %s906_s9  ;;  %s225_s12 = scalar_lea.vmem (!%p1017_p12), [#allocation2], %s563_s10 }
  0x44   : > { %734 = dma.done.wait (%p1018_p1), %s222_s11, 256  }
  0x45   : > { %736 = vsyncadd (%p1018_p1), %s222_s11, 4294967040  ;;  %p1019_p4 = scmp.eq.s32.totalorder %s820_s22, 0 }
  0x47   : > { %738 = dma.done.wait (%p1019_p4), [#allocation6], 512   ;;  %p1020_p6 = pmov %p1019_p4 }
  0x48   : > { %v765_v0 = vmov 0   ;;  %v256_v1 = vld [vmem:[%s225_s12] sm:$0xff]  ;;  %s766_s26 = smov 96   ;;  %s767_s29 = smov 32   ;;  %v257_v2 = vld [vmem:[%s225_s12 + $0x8] sm:$0xff]  ;;  %v262_v5 = vlaneseq }
  0x49   : > { %740 = vsyncadd (%p1020_p6), [#allocation6], 4294966784  ;;  %636 = vset.pattern.permute.xlu1 %v765_v0  ;;  %635 = vset.pattern.permute.xlu0 %v765_v0  ;;  %v432_v3 = vld [vmem:[%s1004_s4] sm:$0xff]  ;;  %v414_v29 = vld [vmem:[#allocation5 + $0x10] ss:$8 sm:$0x3] }
  0x4a   : > { %267 = vrot.lane.b32.xlu1 %v256_v1, %s766_s26  ;;  %258 = vrot.lane.b32.xlu0 %v256_v1, %s767_s29  ;;  %v373_v4 = vld [vmem:[%s1003_s3] sm:$0xff]  ;;  %v278_v6 = vshrl.u32 %v262_v5, 7  ;;  %v263_v7 = vand.u32 127, %v262_v5  ;;  %s572_s23 = sshll.u32 %s820_s22, 8  ;;  %s255_s15 = scalar_lea.vmem [#allocation7], %s563_s10 }
  0x4b   : > { %v397_v10 = vld [vmem:[#allocation5 + $0x7] ss:$8 sm:$0x3]  ;;  %v355_v11 = vld [vmem:[#allocation5 + $0x2] ss:$8 sm:$0x3]  ;;  %s963_s12 = scalar_lea.hbm %s1005_s5, %s572_s23 }
  0x4c   : > { %v926_v8 = vsub.s32 0, %v278_v6  ;;  %v928_v9 = vsub.s32 1, %v278_v6  ;;  %vm271_vm0 = vcmp.lt.s32.totalorder %v263_v7, 96  ;;  %vm264_vm1 = vcmp.lt.s32.totalorder %v263_v7, 32  ;;  %s475_s27 = sshll.u32 %s255_s15, 4  ;;  %p1021_p3 = scmp.ne.s32.totalorder %s1015_s14, 0  ;;  %s476_s27 = int_to_ptr.vmem [resolvable:$true] %s475_s27 }
  0x4d   : > { %v338_v12 = vld [vmem:[#allocation5 + $0x1] ss:$8 sm:$0x3]  ;;  %v275_v15 = vld [vmem:[#allocation5 + $0x3] ss:$8 sm:$0x3] }
  0x4e   : > { %269 = vrot.lane.b32.xlu1 %v257_v2, %s766_s26  ;;  %260 = vrot.lane.b32.xlu0 %v257_v2, %s767_s29  ;;  %v290_v16 = vld [vmem:[#allocation5 + $0x4] ss:$8 sm:$0x3]  ;;  %v323_v17 = vld [vmem:[#allocation5] ss:$8 sm:$0x3]  ;;  %v402_v19 = vrot.slane %v397_v10, %v926_v8  ;;  %v406_v20 = vrot.slane %v397_v10, %v928_v9  ;;  %v360_v21 = vrot.slane %v355_v11, %v926_v8 }
  0x4f   : > { %v382_v18 = vld [vmem:[#allocation5 + $0x6] ss:$8 sm:$0x3]  ;;  %v364_v22 = vrot.slane %v355_v11, %v928_v9  ;;  %v343_v23 = vrot.slane %v338_v12, %v926_v8  ;;  %v347_v24 = vrot.slane %v338_v12, %v928_v9  ;;  %v280_v25 = vrot.slane %v275_v15, %v926_v8  ;;  %v307_v48 = vld [vmem:[#allocation5 + $0x5] ss:$8 sm:$0x3] }
  0x50   : > { %v284_v26 = vrot.slane %v275_v15, %v928_v9  ;;  %v295_v27 = vrot.slane %v290_v16, %v926_v8  ;;  %v299_v28 = vrot.slane %v290_v16, %v928_v9  ;;  %v328_v31 = vrot.slane %v323_v17, %v926_v8  ;;  %v444_v12 = vld [vmem:[%s1002_s2] sm:$0x3]  ;;  %s461_s26 = scalar_lea.sflag [#allocation4], %s906_s9  ;;  %s691_s29 = scalar_lea.vmem %s476_s27, 256 }
  0x51   : > { %v332_v32 = vrot.slane %v323_v17, %v928_v9  ;;  %v387_v33 = vrot.slane %v382_v18, %v926_v8  ;;  %v391_v34 = vrot.slane %v382_v18, %v928_v9  ;;  %v410_v38 = vmul.f32 %v406_v20, %v257_v2  ;;  %p692_p8 = scmp.ne.s32.totalorder %s476_s27, %s691_s29  ;;  %s768_s22 = smov [#allocation7]  }
  0x52   : > { %435 = vperm.xlu1 %636, %v432_v3   ;;  %376 = vperm.xlu0 %635, %v373_v4   ;;  %v409_v39 = vmul.f32 %v402_v19, %v256_v1  ;;  %v351_v42 = vmul.f32 %v347_v24, %v257_v2  ;;  %v350_v43 = vmul.f32 %v343_v23, %v256_v1  ;;  %s695_s10 = sshll.u32 %s768_s22, 4  ;;  %s696_s10 = int_to_ptr.vmem [resolvable:$false] %s695_s10 }
  0x53   : > { %v419_v44 = vrot.slane %v414_v29, %v926_v8  ;;  %v423_v45 = vrot.slane %v414_v29, %v928_v9  ;;  %v303_v46 = vmul.f32 %v299_v28, %v257_v2  ;;  %v302_v47 = vmul.f32 %v295_v27, %v256_v1  ;;  %p693_p11 = pnand %p692_p8, %p1021_p3  ;;  %s697_s6 = scalar_lea.vmem %s696_s10, 512 }
  0x54   : > { %v312_v61 = vrot.slane %v307_v48, %v926_v8  ;;  %v316_v62 = vrot.slane %v307_v48, %v928_v9  ;;  %v453_v23 = vrot.slane %v444_v12, %v928_v9  ;;  %p698_p10 = scmp.lt.s32.totalorder %s476_s27, %s696_s10  ;;  %p699_p2 = scmp.lt.s32.totalorder %s697_s6, %s691_s29 }
  0x55   : > { %p694_p7 = pneg %p693_p11 }
  0x56   : > { %p700_p13 = por %p699_p2, %p698_p10 }
  0x58   : > { %p701_p0 = pnand %p700_p13, %p694_p7 }
  0xbc   : > { %v268_v13 = vpop.permute.xlu1 %267  ;;  %v259_v14 = vpop.permute.xlu0 %258 }
  0xc0   : > { %v270_v30 = vpop.permute.xlu1 %269  ;;  %v261_v35 = vpop.permute.xlu0 %260 }
  0xc1   : > { %v265_v36 = vsel %vm264_vm1, %v259_v14, %v261_v35  ;;  %v266_v37 = vsel %vm264_vm1, %v261_v35, %v259_v14  ;;  %v272_v40 = vsel %vm271_vm0, %v268_v13, %v270_v30  ;;  %v273_v41 = vsel %vm271_vm0, %v270_v30, %v268_v13 }
  0xc2   : > { %v335_v49 = vmul.f32 %v328_v31, %v266_v37  ;;  %v336_v50 = vmul.f32 %v332_v32, %v265_v36  ;;  %v394_v51 = vmul.f32 %v387_v33, %v266_v37  ;;  %v395_v52 = vmul.f32 %v391_v34, %v265_v36 }
  0xc3   : > { %v367_v53 = vmul.f32 %v360_v21, %v272_v40  ;;  %v368_v54 = vmul.f32 %v364_v22, %v273_v41  ;;  %v287_v55 = vmul.f32 %v280_v25, %v266_v37  ;;  %v288_v56 = vmul.f32 %v284_v26, %v265_v36 }
  0xc4   : > { %v411_v57 = vadd.f32 %v409_v39, %v394_v51  ;;  %v412_v58 = vadd.f32 %v410_v38, %v395_v52  ;;  %v353_v59 = vadd.f32 %v351_v42, %v336_v50  ;;  %v352_v60 = vadd.f32 %v350_v43, %v335_v49 }
  0xc5   : > { %v426_v63 = vmul.f32 %v419_v44, %v272_v40  ;;  %v427_v0 = vmul.f32 %v423_v45, %v273_v41  ;;  %v304_v3 = vadd.f32 %v302_v47, %v287_v55  ;;  %v305_v4 = vadd.f32 %v303_v46, %v288_v56 }
  0xc6   : > { %v370_v1 = vadd.f32 %v368_v54, %v353_v59  ;;  %v369_v2 = vadd.f32 %v367_v53, %v352_v60  ;;  %v319_v7 = vmul.f32 %v312_v61, %v272_v40  ;;  %v320_v10 = vmul.f32 %v316_v62, %v273_v41 }
  0xc7   : > { %v428_v5 = vadd.f32 %v426_v63, %v411_v57  ;;  %v429_v6 = vadd.f32 %v427_v0, %v412_v58  ;;  %v449_v22 = vrot.slane %v444_v12, %v926_v8 }
  0xc8   : > { %v372_v11 = vrot.slane %v370_v1, 7  ;;  %v371_v13 = vrot.slane %v369_v2, 7  ;;  %v322_v15 = vadd.f32 %v320_v10, %v305_v4  ;;  %v321_v17 = vadd.f32 %v319_v7, %v304_v3 }
  0xc9   : > { %v430_v18 = vrot.slane %v428_v5, 1  ;;  %v431_v19 = vrot.slane %v429_v6, 1 }
  0xcd   : > { %v436_v14 = vpop.permute.xlu1 %435  ;;  %v377_v16 = vpop.permute.xlu0 %376 }
  0xce   : > { %v379_v20 = vmul.f32 %v377_v16, %v371_v13  ;;  %v380_v21 = vmul.f32 %v377_v16, %v372_v11  ;;  %v438_v24 = vmul.f32 %v436_v14, %v430_v18  ;;  %v439_v25 = vmul.f32 %v436_v14, %v431_v19 }
  0xd0   : > { %v440_v26 = vadd.f32 %v379_v20, %v321_v17  ;;  %v441_v27 = vadd.f32 %v380_v21, %v322_v15 }
  0xd2   : > { %v442_v28 = vadd.f32 %v440_v26, %v438_v24  ;;  %v443_v29 = vadd.f32 %v441_v27, %v439_v25 }
  0xd4   : > { %v456_v30 = vadd.f32 %v449_v22, %v442_v28  ;;  %v457_v31 = vadd.f32 %v453_v23, %v443_v29 }
  0xd6   : > { %458 = vst [vmem:[%s255_s15] sm:$0xff] %v456_v30  ;;  %459 = vst [vmem:[%s255_s15 + $0x8] sm:$0xff] %v457_v31 }
  0xd7   : > { %704 = shalt.err (!%p701_p0)
}
  0xd8   : > { %s705_s24 = scalar_lea.hbm %s963_s12, 256  ;;  %s709_s8 = scalar_lea.hbm %s1005_s5, 512 }
  0xd9   : > { %p706_p5 = scmp.ne.s32.totalorder %s963_s12, %s705_s24  ;;  %p710_p1 = scmp.lt.s32.totalorder %s963_s12, %s1005_s5 }
  0xda   : > { %p711_p4 = scmp.lt.s32.totalorder %s709_s8, %s705_s24 }
  0xdb   : > { %p707_p9 = pnand %p706_p5, %p1021_p3 }
  0xdc   : > { %p712_p6 = por %p711_p4, %p710_p1 }
  0xdd   : > { %p708_p12 = pneg %p707_p9 }
  0xdf   : > { %p713_p8 = pnand %p712_p6, %p708_p12 }
  0xe1   : > { %716 = shalt.err (!%p713_p8)
}
  0xe2   : > { %579 = dma.vmem_to_hbm [thread:$0]  (%p1021_p3), %s476_s27, 256, %s963_s12, %s461_s26  }
  0xe3 PF: > { %s487_s23 = sand.u32 1, %s747_s18   ;;  %p1022_p11 = scmp.ne.s32.totalorder %s1011_s25, 0 }
  0xe4   : > { %p1023_p7 = scmp.ge.s32.totalorder %s759_s21, 2  ;;  %s488_s15 = scalar_lea.sflag [#allocation4], %s487_s23 }
  0xe6   : > { %p590_p10 = pnand %p1023_p7, %p1022_p11 }
  0xe8   : > { %p591_p2 = pneg %p590_p10 }
  0xea   : > { %742 = dma.done.wait (%p591_p2), %s488_s15, 256  }
  0xeb   : > { %744 = vsyncadd (%p591_p2), %s488_s15, 4294967040  ;;  %p19_p13 = scmp.ge.s32.totalorder %s853_s30, 4   ;;  %s1024_s18 = smov %s751_s19 }
  0xec   : > { %s1025_s19 = smov %s755_s20  ;;  %s1026_s20 = smov %s870_s13 }
  0xed   : > { %s1027_s21 = smov %s853_s30  ;;  %21 = sbr.rel (!%p19_p13) target bundleno = 6 (0x6), region = 97 }
  0xf2   :  { %493 = vsyncpa [#allocation3], 1 }
  0xf3   :  { %495 = vsyncpa [#allocation3 + $0x1], 1 }
  0xf4   :  { %496 = vsyncpa [#allocation6], 1 }
  0xf5   :  { %497 = vsyncpa [#allocation4], 1 }
  0xf6   :  { %499 = vsyncpa [#allocation4 + $0x1], 1 }

</bundles_post_ra>
